<compile_context>
chip_gen: v5e
topology: v5e:2x2
jax: 0.10.0
libtpu: 0.0.40
codegen_flags: <defaults>
</compile_context>

<pallas_src>
from functools import partial

import jax
import jax.numpy as jnp
from jax import lax
from jax.experimental import pallas as pl
from jax.experimental.pallas import tpu as pltpu


_VMEM_LIMIT = 32 * 1024 * 1024  # safe scoped-VMEM budget on v5e/v6e/v7x


def _pick_tile(dim, prefs):
    """Largest preferred tile that evenly divides `dim`; else full extent."""
    for p in prefs:
        if dim >= p and dim % p == 0:
            return p
    return dim


# ----------------------------- linear kernel ------------------------------ #
def _linear_kernel(x_ref, w_ref, b_ref, o_ref, acc_ref):
    # x: (tm, tk), w: (tk, tn) (already transposed from torch's (O, K)), b: (1, tn)
    @pl.when(pl.program_id(2) == 0)
    def _():
        acc_ref[...] = jnp.zeros_like(acc_ref)

    acc_ref[...] += jnp.dot(x_ref[...], w_ref[...],
                            preferred_element_type=jnp.float32)

    @pl.when(pl.program_id(2) == pl.num_programs(2) - 1)
    def _():
        o_ref[...] = (acc_ref[...] + b_ref[...].astype(jnp.float32)).astype(o_ref.dtype)


def linear(x2d, w, b):
    M, K = x2d.shape
    O = w.shape[1]
    # 256-aligned N / 512-aligned K tiles feed the 2x256^2 MXU on v6e/v7x;
    # working set (2 inputs x 2 bufs x tile + f32 acc) stays well under the
    # ~32 MiB scoped VMEM budget of v7x.
    tm = _pick_tile(M, (256, 128, 8))
    tn = _pick_tile(O, (256, 128))
    tk = _pick_tile(K, (512, 256, 128))
    grid = (M // tm, O // tn, K // tk)

    itemsize = x2d.dtype.itemsize
    cost = pl.CostEstimate(
        flops=2 * M * K * O,
        transcendentals=0,
        bytes_accessed=(M * K + K * O + O + M * O) * itemsize,
    )

    return pl.pallas_call(
        _linear_kernel,
        out_shape=jax.ShapeDtypeStruct((M, O), x2d.dtype),
        grid_spec=pltpu.PrefetchScalarGridSpec(
            num_scalar_prefetch=0,
            grid=grid,
            in_specs=[
                pl.BlockSpec((tm, tk), lambda i, j, k: (i, k)),
                pl.BlockSpec((tk, tn), lambda i, j, k: (k, j)),
                pl.BlockSpec((1, tn), lambda i, j, k: (0, j)),
            ],
            out_specs=pl.BlockSpec((tm, tn), lambda i, j, k: (i, j)),
            scratch_shapes=[pltpu.VMEM((tm, tn), jnp.float32)],
        ),
        compiler_params=pltpu.CompilerParams(
            dimension_semantics=("parallel", "parallel", "arbitrary"),
            vmem_limit_bytes=_VMEM_LIMIT,
        ),
        cost_estimate=cost,
    )(x2d, w, b)


# --------------------------- attention kernel ------------------------------ #
def _attn_kernel(qkv_ref, out_ref, attn_ref, *, num_heads, head_dim, scale):
    # qkv_ref: (1, N, 3C) for one batch element; columns are [q | k | v],
    # each split into num_heads contiguous head_dim-wide slices (torch layout).
    C = num_heads * head_dim
    for h in range(num_heads):  # static unroll; H is small (4-16)
        lo = h * head_dim
        hi = lo + head_dim
        # Keep MXU inputs in the source dtype; accumulate in f32.
        q = qkv_ref[0, :, lo:hi]
        k = qkv_ref[0, :, C + lo:C + hi]
        v = qkv_ref[0, :, 2 * C + lo:2 * C + hi]

        # Fold the scale into q (N*D multiplies instead of N*N).
        q = q * jnp.asarray(scale, dtype=q.dtype)

        # q (N, D) x k (N, D) contracted on D -> (N, N); no k.T materialized.
        s = lax.dot_general(q, k, dimension_numbers=(((1,), (1,)), ((), ())),
                            preferred_element_type=jnp.float32)

        m = jnp.max(s, axis=-1, keepdims=True)
        p = jnp.exp(s - m)
        l = jnp.sum(p, axis=-1, keepdims=True)
        a = p * pl.reciprocal(l, approx=True)          # softmax (EUP recip)
        # attn_drop (p=0.0) -> identity

        attn_ref[0, h] = a.astype(attn_ref.dtype)

        o = jnp.dot(a.astype(v.dtype), v, preferred_element_type=jnp.float32)
        # Write directly into the lane-dense (N, C) output slab at column h*D.
        out_ref[0, :, lo:hi] = o.astype(out_ref.dtype)


def attention_core(qkv, *, num_heads, head_dim, scale):
    # TODO(synk): for very long sequences (N >~ 1k) tile over query blocks /
    # flash-style KV loop instead of one (N, N) score matrix per head.
    B, N, C3 = qkv.shape
    C = C3 // 3
    kernel = partial(_attn_kernel, num_heads=num_heads, head_dim=head_dim, scale=scale)

    itemsize = qkv.dtype.itemsize
    cost = pl.CostEstimate(
        flops=4 * B * num_heads * N * N * head_dim,
        transcendentals=B * num_heads * N * N,
        bytes_accessed=(B * N * C3 + B * N * C + B * num_heads * N * N) * itemsize,
    )

    return pl.pallas_call(
        kernel,
        out_shape=(
            jax.ShapeDtypeStruct((B, N, C), qkv.dtype),               # context, (B,N,C)
            jax.ShapeDtypeStruct((B, num_heads, N, N), qkv.dtype),    # attn weights
        ),
        grid_spec=pltpu.PrefetchScalarGridSpec(
            num_scalar_prefetch=0,
            grid=(B,),
            in_specs=[pl.BlockSpec((1, N, C3), lambda b: (b, 0, 0))],
            out_specs=(
                pl.BlockSpec((1, N, C), lambda b: (b, 0, 0)),
                pl.BlockSpec((1, num_heads, N, N), lambda b: (b, 0, 0, 0)),
            ),
        ),
        compiler_params=pltpu.CompilerParams(
            dimension_semantics=("parallel",),
            vmem_limit_bytes=_VMEM_LIMIT,
        ),
        cost_estimate=cost,
    )(qkv)


# ------------------------------ module wrapper ----------------------------- #
def attention_forward(x, params, *, num_heads, scale):
    B, N, C = x.shape
    D = C // num_heads

    # qkv projection (qkv_bias=False -> zero bias); stays in (B, N, 3C) layout,
    # no (3, B, H, N, D) transpose round-trip through HBM.
    qkv = linear(x.reshape(B * N, C), params["w_qkv"], params["b_qkv"])
    qkv = qkv.reshape(B, N, 3 * C)

    ctx, attn = attention_core(qkv, num_heads=num_heads, head_dim=D, scale=scale)

    # ctx is already (B, N, C) — no transpose needed before proj.
    xo = linear(ctx.reshape(B * N, C), params["w_proj"], params["b_proj"]).reshape(B, N, C)
    # proj_drop (p=0.0) -> identity
    return xo, attn


# --------------------------------- main ------------------------------------ #
if __name__ == "__main__":
    B, N, C = 2, 8, 32
    num_heads = 4
    head_dim = C // num_heads
    scale = head_dim ** (-0.5)

    key = jax.random.PRNGKey(0)
    kx, kqkv, kproj, kpb = jax.random.split(key, 4)

    x = jax.random.normal(kx, (B, N, C), dtype=jnp.float32)

    params = {
        # stored already transposed to (in, out) for y = x @ W + b
        "w_qkv": 0.02 * jax.random.normal(kqkv, (C, 3 * C), dtype=jnp.float32),
        "b_qkv": jnp.zeros((1, 3 * C), dtype=jnp.float32),  # qkv_bias=False
        "w_proj": 0.02 * jax.random.normal(kproj, (C, C), dtype=jnp.float32),
        "b_proj": 0.02 * jax.random.normal(kpb, (1, C), dtype=jnp.float32),
    }

    out, attn = attention_forward(x, params, num_heads=num_heads, scale=scale)
    out = jax.block_until_ready(out)
    attn = jax.block_until_ready(attn)

    # pure-JAX reference for sanity
    def ref_forward(x):
        qkv = x.reshape(B * N, C) @ params["w_qkv"] + params["b_qkv"]
        qkv = qkv.reshape(B, N, 3, num_heads, head_dim).transpose(2, 0, 3, 1, 4)
        q, k, v = qkv[0], qkv[1], qkv[2]
        s = jnp.einsum("bhqd,bhkd->bhqk", q, k) * scale
        a = jax.nn.softmax(s, axis=-1)
        o = jnp.einsum("bhqk,bhkd->bhqd", a, v)
        o = o.transpose(0, 2, 1, 3).reshape(B * N, C)
        o = o @ params["w_proj"] + params["b_proj"]
        return o.reshape(B, N, C), a

    ref_out, ref_attn = ref_forward(x)
    # tolerance accounts for the approx (EUP) reciprocal in the softmax denom
    assert jnp.allclose(out, ref_out, atol=2e-3, rtol=2e-3)
    assert jnp.allclose(attn, ref_attn, atol=2e-3, rtol=2e-3)
    assert out.shape == (B, N, C) and attn.shape == (B, num_heads, N, N)

    print("KERNEL_OK")
</pallas_src>

<mosaic_0001>
module attributes {stable_mosaic.version = 11 : i64} {
  func.func @_linear_kernel(%arg0: i32, %arg1: i32, %arg2: i32, %arg3: memref<8x32xf32, #tpu.memory_space<vmem>>, %arg4: memref<32x96xf32, #tpu.memory_space<vmem>>, %arg5: memref<1x96xf32, #tpu.memory_space<vmem>>, %arg6: memref<8x96xf32, #tpu.memory_space<vmem>>, %arg7: memref<8x96xf32, #tpu.memory_space<vmem>>) attributes {dimension_semantics = [#tpu.dimension_semantics<parallel>, #tpu.dimension_semantics<parallel>, #tpu.dimension_semantics<arbitrary>], iteration_bounds = array<i64: 2, 1, 1>, scalar_prefetch = 0 : i64, scratch_operands = 1 : i64, tpu.core_type = #tpu.core_type<tc>, window_params = [{transform_indices = @transform_0, window_bounds = array<i64: 8, 32>}, {transform_indices = @transform_1, window_bounds = array<i64: 32, 96>}, {transform_indices = @transform_2, window_bounds = array<i64: 1, 96>}, {transform_indices = @transform_3, window_bounds = array<i64: 8, 96>}]} {
    %c0_i32 = arith.constant 0 : i32
    %0 = arith.cmpi eq, %arg2, %c0_i32 : i32
    %1 = arith.extui %0 : i1 to i32
    %c0_i32_0 = arith.constant 0 : i32
    %2 = arith.cmpi ne, %1, %c0_i32_0 : i32
    scf.if %2 {
      %cst_10 = arith.constant 0.000000e+00 : f32
      %12 = vector.broadcast %cst_10 : f32 to vector<8x96xf32>
      %c0_11 = arith.constant 0 : index
      %c0_12 = arith.constant 0 : index
      %13 = vector.load %arg7[%c0_11, %c0_12] : memref<8x96xf32, #tpu.memory_space<vmem>>, vector<8x96xf32>
      tpu.vector_store %arg7[%c0_11, %c0_12], %12 {strides = array<i32>} : memref<8x96xf32, #tpu.memory_space<vmem>>, vector<8x96xf32>,
    } else {
    }
    %c0 = arith.constant 0 : index
    %c0_1 = arith.constant 0 : index
    %3 = vector.load %arg7[%c0, %c0_1] : memref<8x96xf32, #tpu.memory_space<vmem>>, vector<8x96xf32>
    %c0_2 = arith.constant 0 : index
    %c0_3 = arith.constant 0 : index
    %4 = vector.load %arg3[%c0_2, %c0_3] : memref<8x32xf32, #tpu.memory_space<vmem>>, vector<8x32xf32>
    %c0_4 = arith.constant 0 : index
    %c0_5 = arith.constant 0 : index
    %5 = vector.load %arg4[%c0_4, %c0_5] : memref<32x96xf32, #tpu.memory_space<vmem>>, vector<32x96xf32>
    %cst = arith.constant dense<0.000000e+00> : vector<8x96xf32>
    %6 = tpu.matmul %4, %5, %cst {dimension_numbers = #tpu.dot_dimension_numbers<[1], [0], [0], [1], [0, 0, 1, 1], [], []>} : vector<8x32xf32>, vector<32x96xf32>, vector<8x96xf32> -> vector<8x96xf32>
    %7 = arith.addf %3, %6 : vector<8x96xf32>
    %c0_6 = arith.constant 0 : index
    %c0_7 = arith.constant 0 : index
    %8 = vector.load %arg7[%c0_6, %c0_7] : memref<8x96xf32, #tpu.memory_space<vmem>>, vector<8x96xf32>
    tpu.vector_store %arg7[%c0_6, %c0_7], %7 {strides = array<i32>} : memref<8x96xf32, #tpu.memory_space<vmem>>, vector<8x96xf32>,
    %c0_i32_8 = arith.constant 0 : i32
    %9 = arith.cmpi eq, %arg2, %c0_i32_8 : i32
    %10 = arith.extui %9 : i1 to i32
    %c0_i32_9 = arith.constant 0 : i32
    %11 = arith.cmpi ne, %10, %c0_i32_9 : i32
    scf.if %11 {
      %c0_10 = arith.constant 0 : index
      %c0_11 = arith.constant 0 : index
      %12 = vector.load %arg7[%c0_10, %c0_11] : memref<8x96xf32, #tpu.memory_space<vmem>>, vector<8x96xf32>
      %c0_12 = arith.constant 0 : index
      %c0_13 = arith.constant 0 : index
      %13 = vector.load %arg5[%c0_12, %c0_13] : memref<1x96xf32, #tpu.memory_space<vmem>>, vector<1x96xf32>
      %14 = vector.broadcast %13 : vector<1x96xf32> to vector<8x96xf32>
      %15 = arith.addf %12, %14 : vector<8x96xf32>
      %c0_14 = arith.constant 0 : index
      %c0_15 = arith.constant 0 : index
      %16 = vector.load %arg6[%c0_14, %c0_15] : memref<8x96xf32, #tpu.memory_space<vmem>>, vector<8x96xf32>
      tpu.vector_store %arg6[%c0_14, %c0_15], %15 {strides = array<i32>} : memref<8x96xf32, #tpu.memory_space<vmem>>, vector<8x96xf32>,
    } else {
    }
    return
  }
  func.func @transform_0(%arg0: i32, %arg1: i32, %arg2: i32) -> (i32, i32) {
    %c0_i32 = arith.constant 0 : i32
    return %arg0, %arg2 : i32, i32
  }
  func.func @transform_1(%arg0: i32, %arg1: i32, %arg2: i32) -> (i32, i32) {
    %c0_i32 = arith.constant 0 : i32
    return %arg2, %arg1 : i32, i32
  }
  func.func @transform_2(%arg0: i32, %arg1: i32, %arg2: i32) -> (i32, i32) {
    %c0_i32 = arith.constant 0 : i32
    %c0_i32_0 = arith.constant 0 : i32
    return %c0_i32, %arg1 : i32, i32
  }
  func.func @transform_3(%arg0: i32, %arg1: i32, %arg2: i32) -> (i32, i32) {
    %c0_i32 = arith.constant 0 : i32
    return %arg0, %arg1 : i32, i32
  }
}

</mosaic_0001>

<bundles_post_ra>
// kernel: tpu_custom_call.1
= control target key start
LH: loop header
LB: loop body
LE: loop exit
PB: predicated region body
PF: predicated region fallthrough
CT: control target
= control target key end

     0   :  { %8 = vsyncpa [#allocation4], 0  ;;  %s845_s0 = inlined_call_operand.hbm [shape: f32[16,32], index: 0, kind: input, shape index: {}]   ;;  %s846_s1 = inlined_call_operand.hbm [shape: f32[32,96], index: 1, kind: input, shape index: {}]   ;;  %s847_s2 = inlined_call_operand.vmem [shape: f32[1,96], index: 2, kind: input, shape index: {}]   ;;  %s848_s3 = inlined_call_operand.hbm [shape: f32[16,96], index: 3, kind: output, shape index: {}]  }
   0x1   :  { %10 = vsyncpa [#allocation4 + $0x1], 0 }
   0x2   :  { %11 = vsyncpa [#allocation7], 0 }
   0x3   :  { %12 = vsyncpa [#allocation5], 0 }
   0x4   :  { %14 = vsyncpa [#allocation5 + $0x1], 0  ;;  %s696_s12 = smov 0   ;;  %s698_s13 = smov 0  }
   0x5   :  { %s700_s14 = smov 0   ;;  %s702_s15 = smov 0  }
   0x6   :  { %s704_s16 = smov 0   ;;  %s706_s17 = smov 0  }
   0x7 LB: > { %s430_s18 = sadd.s32 4294967295, %s670_s17   ;;  %p432_p0 = scmp.ge.s32.totalorder %s670_s17, 1  ;;  %s670_s17 = sphi %s706_s17, %s20_s17   ;;  %s666_s16 = sphi %s704_s16, %s859_s16   ;;  %s662_s15 = sphi %s702_s15, %s858_s15   ;;  %s658_s14 = sphi %s700_s14, %s857_s14   ;;  %s654_s13 = sphi %s698_s13, %s856_s13   ;;  %s650_s12 = sphi %s696_s12, %s855_s12  }
   0x8   : > { %p728_p1 = scmp.eq.s32.totalorder %s430_s18, 0  ;;  %p154_p2 = scmp.lt.s32.totalorder %s670_s17, 3 }
   0x9   : > { %s169_s22 = sshll.u32 %s846_s1, 4  ;;  %s672_s24 = smov [#allocation6]   ;;  %s170_s22 = int_to_ptr.hbm [resolvable:$true] %s169_s22 }
   0xa   : > { %p736_p3 = pnand %p432_p0, %p154_p2  ;;  %s171_s25 = sshll.u32 %s672_s24, 4  ;;  %s172_s25 = int_to_ptr.vmem [resolvable:$true] %s171_s25 }
   0xb   : > { %p435_p6 = scmp.ge.s32.totalorder %s670_s17, 2  ;;  %s673_s26 = smov 128  }
   0xc   : > { %p455_p4 = pneg %p736_p3  ;;  %s674_s27 = smov 8  }
   0xd   : > { %s431_s28 = sadd.s32 4294967294, %s670_s17   ;;  %s39_s29 = sadd.s32 1, %s666_s16 }
   0xe   : > { %p456_p5 = pnand %p455_p4, %p728_p1  ;;  %s48_s30 = sadd.s32 1, %s658_s14 }
   0xf   : > { %p41_p7 = scmp.ge.s32.totalorder %s39_s29, 2  ;;  %p55_p8 = scmp.ne.s32.totalorder %s658_s14, %s654_s13 }
  0x10   : > { %458 = dma.hbm_to_vmem [thread:$0]  (!%p456_p5), %s170_s22, 512, %s172_s25, [#allocation7], %s673_s26, %s673_s26, %s674_s27  }
  0x11   : > { %p56_p9 = scmp.eq.s32.totalorder %s670_s17, 0  ;;  %p61_p10 = scmp.ne.s32.totalorder %s654_s13, %s650_s12 }
  0x12   : > { %s861_s29 = smov (%p41_p7, %s39_s29), 0  ;;  %p141_p13 = scmp.eq.s32.totalorder %s430_s18, 1 }
  0x13   : > { %p755_p11 = por %p56_p9, %p55_p8  ;;  %p761_p12 = por %p728_p1, %p61_p10 }
  0x14   : > { %s43_s6 = ssub.s32 %s666_s16, %s861_s29  ;;  %p147_p2 = scmp.eq.s32.totalorder %s431_s28, 1 }
  0x15   : > { %p46_p0 = scmp.eq.s32.totalorder %s43_s6, 0  ;;  %p767_p4 = por %p141_p13, %p55_p8 }
  0x16   : > { %p468_p5 = scmp.lt.s32.totalorder %s670_s17, 2  ;;  %p775_p7 = por %p147_p2, %p61_p10 }
  0x17   : > { %s773_s8 = scalar_select %p46_p0, %s658_s14, %s48_s30  }
  0x18   : > { %s191_s10 = sand.u32 1, %s658_s14   ;;  %s437_s20 = sshll.u32 %s666_s16, 3 }
  0x19   : > { %s436_s11 = sshll.u32 %s191_s10, 3  ;;  %s200_s18 = scalar_lea.hbm %s845_s0, %s437_s20 }
  0x1a   : > { %s195_s24 = scalar_lea.vmem [#allocation3], %s436_s11  ;;  %s202_s26 = sshll.u32 %s200_s18, 4  ;;  %s203_s26 = int_to_ptr.hbm [resolvable:$true] %s202_s26 }
  0x1b   : > { %s204_s25 = sshll.u32 %s195_s24, 4  ;;  %p460_p8 = pnand %p468_p5, %p755_p11  ;;  %s205_s25 = int_to_ptr.vmem [resolvable:$true] %s204_s25 }
  0x1c   : > { %s192_s27 = scalar_lea.sflag [#allocation4], %s191_s10  ;;  %213 = sbr.rel (%p736_p3) target bundleno = 185 (0xb9), region = 32 }
  0x1d   : > { %462 = dma.hbm_to_vmem [thread:$0]  (!%p460_p8), %s203_s26, 128, %s205_s25, %s192_s27  }
  0x1e   : > { %s789_s28 = sand.u32 (!%p736_p3), 1, %s654_s13  }
  0x1f   : > { %s439_s30 = sshll.u32 (!%p736_p3), %s789_s28, 3  ;;  %s216_s6 = scalar_lea.sflag (!%p736_p3), [#allocation4], %s789_s28 }
  0x20   : > { %s219_s11 = scalar_lea.vmem (!%p736_p3), [#allocation3], %s439_s30 }
  0x21   : > { %637 = dma.done.wait (%p761_p12), %s216_s6, 128  }
  0x22   : > { %639 = vsyncadd (%p761_p12), %s216_s6, 4294967168 }
  0x23   : > { %641 = dma.done.wait (%p728_p1), [#allocation7], 512  }
  0x24   : > { %643 = vsyncadd (%p728_p1), [#allocation7], 4294966784  ;;  %vm259_vm0 = vcmask 785408   ;;  %v675_v0 = vmov 0.0   ;;  %v266_v1 = vld [vmem:[#allocation6 + $0x18] sm:$0xff]  ;;  %v265_v2 = vld [vmem:[#allocation6 + $0x10] sm:$0xff] }
  0x25   : > { %260 = vst.msk [vmem:[#allocation2] sm:$0xff] %vm259_vm0, %v675_v0  ;;  %283 = vmatpush.msra.mxu0 %v266_v1  ;;  %v264_v3 = vld [vmem:[#allocation6 + $0x8] sm:$0xff]  ;;  %v263_v4 = vld [vmem:[#allocation6] sm:$0xff]  ;;  %v262_v5 = vld [vmem:[%s219_s11] sm:$0xff]  ;;  %vm267_vm1 = vcmask 261120   ;;  %s444_s19 = sshll.u32 %s662_s15, 3 }
  0x26   : > { %s316_s5 = scalar_lea.hbm %s848_s3, %s444_s19  ;;  %v523_v9 = vld [vmem:[%s847_s2] ss:$0 sm:$0xff]  ;;  %s250_s21 = scalar_lea.vmem [#allocation8], %s439_s30 }
  0x27   : > { %284 = vmatpush.msra.mxu0 %v265_v2  ;;  %s318_s22 = sshll.u32 %s250_s21, 4  ;;  %s320_s18 = sshll.u32 %s316_s5, 4  ;;  %s319_s22 = int_to_ptr.vmem [resolvable:$true] %s318_s22  ;;  %s321_s18 = int_to_ptr.hbm [resolvable:$true] %s320_s18 }
  0x28   : > { %s305_s15 = scalar_lea.sflag [#allocation5], %s789_s28  ;;  %s598_s24 = sshra.s32 %s321_s18, 4  ;;  %s599_s24 = int_to_ptr.hbm [resolvable:$true] %s598_s24 }
  0x29   : > { %285 = vmatpush.msra.mxu0 %v264_v3  ;;  %s600_s25 = scalar_lea.hbm %s599_s24, 8  ;;  %s604_s30 = scalar_lea.hbm %s848_s3, 16 }
  0x2a   : > { %p601_p1 = scmp.ne.s32.totalorder %s599_s24, %s600_s25  ;;  %p605_p10 = scmp.lt.s32.totalorder %s599_s24, %s848_s3 }
  0x2b   : > { %286 = vmatpush.msra.mxu0 %v263_v4  ;;  %p606_p11 = scmp.lt.s32.totalorder %s604_s30, %s600_s25 }
  0x2c   : > { %442 = vmatmul.msk.f32.vlgmr.msra.gmra.mxu0 %vm267_vm1, %v262_v5  ;;  %v261_v6 = vld [vmem:[#allocation2] sm:$0xff]  ;;  %p602_p3 = pnand %p601_p1, %p767_p4 }
  0x2d   : > { %p607_p12 = por %p606_p11, %p605_p10 }
  0x2e   : > { %p603_p9 = pneg %p602_p3 }
  0x30   : > { %p608_p13 = pnand %p607_p12, %p603_p9 }
  0xa9   : > { %v288_v7 = vpop.f32.mrf.mxu0 }
  0xaa   : > { %v291_v8 = vadd.f32 %v288_v7, %v261_v6 }
  0xac   : > { %293 = vst.msk [vmem:[#allocation2] sm:$0xff] %vm259_vm0, %v291_v8 }
  0xb3   : > { %v297_v10 = vld [vmem:[#allocation2] sm:$0xff] }
  0xb4   : > { %v302_v11 = vadd.f32 %v523_v9, %v297_v10 }
  0xb6   : > { %303 = vst.msk [vmem:[%s250_s21] sm:$0xff] %vm259_vm0, %v302_v11 }
  0xb7   : > { %611 = shalt.err (!%p608_p13)
}
  0xb8   : > { %453 = dma.vmem_to_hbm [thread:$0]  (%p767_p4), %s319_s22, 128, %s321_s18, %s305_s15  }
  0xb9 PF: > { %s332_s28 = sand.u32 1, %s650_s12   ;;  %p464_p0 = pnand %p435_p6, %p775_p7 }
  0xba   : > { %s333_s19 = scalar_lea.sflag [#allocation5], %s332_s28 }
  0xbb   : > { %p465_p2 = pneg %p464_p0 }
  0xbd   : > { %645 = dma.done.wait (%p465_p2), %s333_s19, 128  }
  0xbe   : > { %647 = vsyncadd (%p465_p2), %s333_s19, 4294967168  ;;  %s20_s17 = sadd.s32 1, %s670_s17   ;;  %s855_s12 = smov %s654_s13 }
  0xbf   : > { %p17_p5 = scmp.ge.s32.totalorder %s20_s17, 4   ;;  %s856_s13 = smov %s658_s14 }
  0xc0   : > { %s857_s14 = smov %s773_s8  ;;  %s858_s15 = smov %s666_s16 }
  0xc1   : > { %s859_s16 = smov %s861_s29  ;;  %19 = sbr.rel (!%p17_p5) target bundleno = 7 (0x7), region = 93 }
  0xc6   :  { %339 = vsyncpa [#allocation4], 1 }
  0xc7   :  { %341 = vsyncpa [#allocation4 + $0x1], 1 }
  0xc8   :  { %342 = vsyncpa [#allocation7], 1 }
  0xc9   :  { %343 = vsyncpa [#allocation5], 1 }
  0xca   :  { %345 = vsyncpa [#allocation5 + $0x1], 1 }

</bundles_post_ra>
